<compile_context>
chip_gen: v7x
topology: tpu7x:2x2x1
jax: 0.10.0
libtpu: 0.0.40
codegen_flags: <defaults>
</compile_context>

<pallas_src>
import math

import jax
import jax.numpy as jnp
from jax.experimental import pallas as pl
from jax.experimental.pallas import tpu as pltpu


def _round_up(x, m):
    return (x + m - 1) // m * m


def _pick_tile(dim, candidates):
    for c in candidates:
        if c is not None and dim % c == 0:
            return c
    return dim


# --------------------------- support = X @ W ---------------------------

def _support_kernel(x_ref, w_ref, s_ref):
    s_ref[...] = jnp.dot(
        x_ref[...], w_ref[...], preferred_element_type=jnp.float32
    ).astype(s_ref.dtype)


def _compute_support(x_p, w_p, *, tm, tn, out_dtype):
    n_pad, f_in = x_p.shape
    f_out_pad = w_p.shape[1]
    return pl.pallas_call(
        _support_kernel,
        out_shape=jax.ShapeDtypeStruct((n_pad, f_out_pad), out_dtype),
        grid_spec=pltpu.PrefetchScalarGridSpec(
            num_scalar_prefetch=0,
            grid=(n_pad // tm, f_out_pad // tn),
            in_specs=[
                pl.BlockSpec((tm, f_in), lambda i, j: (i, 0)),   # X row tile
                pl.BlockSpec((f_in, tn), lambda i, j: (0, j)),   # W col tile
            ],
            out_specs=pl.BlockSpec((tm, tn), lambda i, j: (i, j)),
        ),
        compiler_params=pltpu.CompilerParams(
            dimension_semantics=("parallel", "parallel"),
            vmem_limit_bytes=64 * 1024 * 1024,
        ),
    )(x_p, w_p)


# ---------------------- out = adj @ support + bias ----------------------

def _adj_matmul_kernel(adj_ref, s_ref, b_ref, o_ref, acc_ref):
    # K-tiled contraction over the node dimension with an f32 accumulator.
    @pl.when(pl.program_id(2) == 0)
    def _():
        acc_ref[...] = jnp.zeros_like(acc_ref)

    acc_ref[...] += jnp.dot(
        adj_ref[...], s_ref[...], preferred_element_type=jnp.float32
    )

    @pl.when(pl.program_id(2) == pl.num_programs(2) - 1)
    def _():
        o_ref[...] = (acc_ref[...] + b_ref[...]).astype(o_ref.dtype)


def _adj_matmul(adj_p, support, bias2d, *, tm, tn, tk, out_dtype):
    n_pad = adj_p.shape[0]
    f_out_pad = support.shape[1]
    return pl.pallas_call(
        _adj_matmul_kernel,
        out_shape=jax.ShapeDtypeStruct((n_pad, f_out_pad), out_dtype),
        grid_spec=pltpu.PrefetchScalarGridSpec(
            num_scalar_prefetch=0,
            grid=(n_pad // tm, f_out_pad // tn, n_pad // tk),
            in_specs=[
                pl.BlockSpec((tm, tk), lambda i, j, k: (i, k)),  # adj tile
                pl.BlockSpec((tk, tn), lambda i, j, k: (k, j)),  # support tile
                pl.BlockSpec((1, tn), lambda i, j, k: (0, j)),   # bias tile
            ],
            out_specs=pl.BlockSpec((tm, tn), lambda i, j, k: (i, j)),
            scratch_shapes=[pltpu.VMEM((tm, tn), jnp.float32)],
        ),
        compiler_params=pltpu.CompilerParams(
            # Reduction axis last; row / out-col axes parallel (megacore on v7x).
            dimension_semantics=("parallel", "parallel", "arbitrary"),
            vmem_limit_bytes=64 * 1024 * 1024,
        ),
    )(adj_p, support, bias2d)


# ------------------------------- wrapper --------------------------------

def gcn_forward(adj, x, weight, bias=None, *, tm=128, tn=None, tk=None,
                compute_dtype=None, out_dtype=None):
    """Fused GCN layer: (adj @ (x @ weight)) + bias.

    compute_dtype: dtype fed to the MXU (e.g. jnp.bfloat16); accumulation is
    always f32. out_dtype: dtype of the returned array.
    """
    N, f_in = x.shape
    f_out = weight.shape[1]
    assert adj.shape == (N, N), "adj must be (N, N)"

    out_dtype = out_dtype if out_dtype is not None else x.dtype
    compute_dtype = compute_dtype if compute_dtype is not None else x.dtype

    # Lane-dense padding: node dim and out_features rounded up to 128.
    n_pad = _round_up(N, 128)
    f_out_pad = _round_up(f_out, 128)

    tm = tm if (tm is not None and n_pad % tm == 0) else _pick_tile(n_pad, (256, 128))
    tk = tk if (tk is not None and n_pad % tk == 0) else _pick_tile(n_pad, (512, 256, 128))
    tn = tn if (tn is not None and f_out_pad % tn == 0) else _pick_tile(f_out_pad, (256, 128))

    adj_p = jnp.pad(adj, ((0, n_pad - N), (0, n_pad - N))).astype(compute_dtype)
    x_p = jnp.pad(x, ((0, n_pad - N), (0, 0))).astype(compute_dtype)
    w_p = jnp.pad(weight, ((0, 0), (0, f_out_pad - f_out))).astype(compute_dtype)
    if bias is None:
        b_p = jnp.zeros((1, f_out_pad), jnp.float32)
    else:
        b_p = jnp.pad(bias.astype(jnp.float32),
                      (0, f_out_pad - f_out)).reshape(1, f_out_pad)

    # 1) support = X @ W   (separate small kernel -> enables parallel grid below)
    support = _compute_support(x_p, w_p, tm=tm, tn=tn, out_dtype=compute_dtype)
    # 2) out = adj @ support + bias   (K-tiled, f32 accumulator)
    out_p = _adj_matmul(adj_p, support, b_p, tm=tm, tn=tn, tk=tk,
                        out_dtype=out_dtype)

    return out_p[:N, :f_out]


def init_gcn_params(key, in_features, out_features):
    """Matches reset_parameters(xariv=True): xavier_normal_(weight), bias=0."""
    std = math.sqrt(2.0 / float(in_features + out_features))
    weight = std * jax.random.normal(key, (in_features, out_features), jnp.float32)
    bias = jnp.zeros((out_features,), jnp.float32)
    return weight, bias


if __name__ == "__main__":
    N = 64             # number of graph nodes
    in_features = 32
    out_features = 16

    root = jax.random.PRNGKey(0)
    k_x, k_adj, k_w = jax.random.split(root, 3)

    x = jax.random.normal(k_x, (N, in_features), jnp.float32)
    # symmetric, row-normalized adjacency (values don't matter for the kernel)
    a = jax.random.uniform(k_adj, (N, N), jnp.float32)
    adj = (a + a.T) * 0.5
    adj = adj / jnp.sum(adj, axis=1, keepdims=True)

    weight, bias = init_gcn_params(k_w, in_features, out_features)

    # f32 path — tight correctness check against the PyTorch forward semantics.
    out = gcn_forward(adj, x, weight, bias)
    out = jax.block_until_ready(out)
    ref = adj @ (x @ weight) + bias[None, :]
    assert out.shape == (N, out_features)
    assert jnp.allclose(out, ref, atol=1e-4, rtol=1e-4), (
        f"max abs err = {jnp.max(jnp.abs(out - ref))}"
    )

    # bf16 MXU inputs with f32 accumulation (perf path) — loose tolerance.
    out_bf16 = gcn_forward(adj, x, weight, bias,
                           compute_dtype=jnp.bfloat16, out_dtype=jnp.float32)
    out_bf16 = jax.block_until_ready(out_bf16)
    assert jnp.allclose(out_bf16, ref, atol=1e-1, rtol=1e-1), (
        f"bf16 max abs err = {jnp.max(jnp.abs(out_bf16 - ref))}"
    )

    print("KERNEL_OK")
</pallas_src>

<mosaic_0001>
module attributes {stable_mosaic.version = 11 : i64} {
  func.func @_support_kernel(%arg0: i32, %arg1: i32, %arg2: memref<128x32xf32, #tpu.memory_space<vmem>>, %arg3: memref<32x128xf32, #tpu.memory_space<vmem>>, %arg4: memref<128x128xf32, #tpu.memory_space<vmem>>) attributes {dimension_semantics = [#tpu.dimension_semantics<parallel>, #tpu.dimension_semantics<parallel>], iteration_bounds = array<i64: 1, 1>, scalar_prefetch = 0 : i64, scratch_operands = 0 : i64, tpu.core_type = #tpu.core_type<tc>, window_params = [{transform_indices = @transform_0, window_bounds = array<i64: 128, 32>}, {transform_indices = @transform_1, window_bounds = array<i64: 32, 128>}, {transform_indices = @transform_2, window_bounds = array<i64: 128, 128>}]} {
    %c0 = arith.constant 0 : index
    %c0_0 = arith.constant 0 : index
    %0 = vector.load %arg2[%c0, %c0_0] : memref<128x32xf32, #tpu.memory_space<vmem>>, vector<128x32xf32>
    %c0_1 = arith.constant 0 : index
    %c0_2 = arith.constant 0 : index
    %1 = vector.load %arg3[%c0_1, %c0_2] : memref<32x128xf32, #tpu.memory_space<vmem>>, vector<32x128xf32>
    %cst = arith.constant dense<0.000000e+00> : vector<128x128xf32>
    %2 = tpu.matmul %0, %1, %cst {dimension_numbers = #tpu.dot_dimension_numbers<[1], [0], [0], [1], [0, 0, 1, 1], [], []>} : vector<128x32xf32>, vector<32x128xf32>, vector<128x128xf32> -> vector<128x128xf32>
    %c0_3 = arith.constant 0 : index
    %c0_4 = arith.constant 0 : index
    %3 = vector.load %arg4[%c0_3, %c0_4] : memref<128x128xf32, #tpu.memory_space<vmem>>, vector<128x128xf32>
    tpu.vector_store %arg4[%c0_3, %c0_4], %2 {strides = array<i32>} : memref<128x128xf32, #tpu.memory_space<vmem>>, vector<128x128xf32>,
    return
  }
  func.func @transform_0(%arg0: i32, %arg1: i32) -> (i32, i32) {
    %c0_i32 = arith.constant 0 : i32
    %c0_i32_0 = arith.constant 0 : i32
    return %arg0, %c0_i32 : i32, i32
  }
  func.func @transform_1(%arg0: i32, %arg1: i32) -> (i32, i32) {
    %c0_i32 = arith.constant 0 : i32
    %c0_i32_0 = arith.constant 0 : i32
    return %c0_i32, %arg1 : i32, i32
  }
  func.func @transform_2(%arg0: i32, %arg1: i32) -> (i32, i32) {
    %c0_i32 = arith.constant 0 : i32
    return %arg0, %arg1 : i32, i32
  }
}

</mosaic_0001>

<bundles_post_ra>
// kernel: tpu_custom_call.1
= control target key start
LH: loop header
LB: loop body
LE: loop exit
PB: predicated region body
PF: predicated region fallthrough
CT: control target
= control target key end

     0   :  { %7 = vsyncpa [#allocation3], 0  ;;  %s526_s0 = inlined_call_operand.hbm [shape: f32[128,32], index: 0, kind: input, shape index: {}]   ;;  %s527_s1 = inlined_call_operand.hbm [shape: f32[32,128], index: 1, kind: input, shape index: {}]   ;;  %s528_s2 = inlined_call_operand.hbm [shape: f32[128,128], index: 2, kind: output, shape index: {}]  }
   0x1   :  { %8 = vsyncpa [#allocation6], 0 }
   0x2   :  { %9 = vsyncpa [#allocation4], 0  ;;  %s445_s9 = smov [#allocation2]   ;;  %s373_s13 = scalar_lea.hbm %s526_s0, 2048 }
   0x3   :  { %s15_s10 = sshll.u32 %s445_s9, 4  ;;  %p374_p0 = scmp.ne.s32.totalorder %s526_s0, %s373_s13  ;;  %s16_s10 = int_to_ptr.vmem [resolvable:$true] %s15_s10 }
   0x4   :  { %p377_p1 = scmp.lt.u32.totalorder %s373_s13, %s526_s0 }
   0x6   :  { %p379_p2 = pnand %p377_p1, %p374_p0 }
   0x8   :  { %382 = shalt.err (!%p379_p2)
}
   0x9   :  { %s383_s18 = scalar_lea.vmem %s16_s10, 2048  ;;  %p388_p4 = scmp.lt.s32.totalorder %s16_s10, %s16_s10 }
   0xa   :  { %p384_p3 = scmp.ne.s32.totalorder %s16_s10, %s383_s18  ;;  %p389_p5 = scmp.lt.s32.totalorder %s383_s18, %s383_s18 }
   0xc   :  { %p390_p6 = por %p389_p5, %p388_p4 }
   0xe   :  { %p391_p7 = pnand %p390_p6, %p384_p3 }
  0x10   :  { %394 = shalt.err (!%p391_p7)
}
  0x11   :  { %s446_s19 = smov 128   ;;  %s447_s20 = smov 8  }
  0x12   :  { %21 = dma.hbm_to_vmem [thread:$0]  %s526_s0, 2048, %s16_s10, [#allocation3], %s446_s19, %s446_s19, %s447_s20  }
  0x13   :  { %s448_s23 = smov [#allocation5]   ;;  %s395_s27 = scalar_lea.hbm %s527_s1, 512 }
  0x14   :  { %s27_s24 = sshll.u32 %s448_s23, 4  ;;  %p396_p8 = scmp.ne.s32.totalorder %s527_s1, %s395_s27  ;;  %s28_s24 = int_to_ptr.vmem [resolvable:$true] %s27_s24 }
  0x15   :  { %p399_p9 = scmp.lt.u32.totalorder %s395_s27, %s527_s1 }
  0x17   :  { %p401_p10 = pnand %p399_p9, %p396_p8 }
  0x19   :  { %404 = shalt.err (!%p401_p10)
}
  0x1a   :  { %s405_s4 = scalar_lea.vmem %s28_s24, 512  ;;  %p410_p12 = scmp.lt.s32.totalorder %s28_s24, %s28_s24 }
  0x1b   :  { %p406_p11 = scmp.ne.s32.totalorder %s28_s24, %s405_s4  ;;  %p411_p13 = scmp.lt.s32.totalorder %s405_s4, %s405_s4 }
  0x1d   :  { %p412_p0 = por %p411_p13, %p410_p12 }
  0x1f   :  { %p413_p1 = pnand %p412_p0, %p406_p11 }
  0x21   :  { %416 = shalt.err (!%p413_p1)
}
  0x22   :  { %33 = dma.hbm_to_vmem [thread:$0]  %s527_s1, 512, %s28_s24, [#allocation6], %s446_s19, %s446_s19, %s447_s20  }
  0x23   :  { %439 = dma.done.wait [#allocation3], 2048  }
  0x24   :  { %440 = vsyncadd [#allocation3], 4294965248 }
  0x25   :  { %441 = dma.done.wait [#allocation6], 512  }
  0x26   :  { %442 = vsyncadd [#allocation6], 4294966784  ;;  %vm60_vm0 = vcmask 261120   ;;  %v56_v0 = vld [vmem:[#allocation5] sm:$0xff]  ;;  %v57_v1 = vld [vmem:[#allocation5 + $0x8] sm:$0xff]  ;;  %s449_s1 = smov [#allocation7]  }
  0x27   :  { %v58_v2 = vld [vmem:[#allocation5 + $0x10] sm:$0xff]  ;;  %v356_v3 = vpack.c.bf16 %v57_v1, %v56_v0  ;;  %v59_v4 = vld [vmem:[#allocation5 + $0x18] sm:$0xff]  ;;  %v40_v5 = vld [vmem:[#allocation2] sm:$0xff]  ;;  %s275_s6 = sshll.u32 %s449_s1, 4  ;;  %s276_s6 = int_to_ptr.vmem [resolvable:$true] %s275_s6 }
  0x28   :  { %v48_v6 = vld [vmem:[#allocation2 + $0x40] sm:$0xff]  ;;  %v360_v7 = vpack.c.bf16 %v59_v4, %v58_v2  ;;  %332 = vmatprep.mubr.msk.f32.mxu0 %vm60_vm0, %v40_v5  ;;  %v41_v8 = vld [vmem:[#allocation2 + $0x8] sm:$0xff]  ;;  %v42_v10 = vld [vmem:[#allocation2 + $0x10] sm:$0xff]  ;;  %s417_s7 = scalar_lea.vmem %s276_s6, 2048  ;;  %p422_p3 = scmp.lt.s32.totalorder %s276_s6, %s276_s6 }
  0x29   :  { %344 = vmatprep.mubr.msk.f32.mxu1 %vm60_vm0, %v48_v6  ;;  %357 = vmatprep.subr.bf16.mxu0 %v356_v3  ;;  %v49_v9 = vld [vmem:[#allocation2 + $0x48] sm:$0xff]  ;;  %v50_v11 = vld [vmem:[#allocation2 + $0x50] sm:$0xff]  ;;  %v43_v12 = vld [vmem:[#allocation2 + $0x18] sm:$0xff]  ;;  %p418_p2 = scmp.ne.s32.totalorder %s276_s6, %s417_s7  ;;  %p423_p4 = scmp.lt.s32.totalorder %s417_s7, %s417_s7 }
  0x2a   :  { %364 = vmatprep.subr.bf16.mxu1 %v356_v3  ;;  %359 = vmatpush3.bf16.msra.mxu0 %v356_v3  ;;  %v51_v13 = vld [vmem:[#allocation2 + $0x58] sm:$0xff]  ;;  %v44_v14 = vld [vmem:[#allocation2 + $0x20] sm:$0xff]  ;;  %v45_v16 = vld [vmem:[#allocation2 + $0x28] sm:$0xff] }
  0x2b   :  { %366 = vmatpush3.bf16.msra.mxu1 %v356_v3  ;;  %361 = vmatprep.subr.bf16.mxu0 %v360_v7  ;;  %v52_v15 = vld [vmem:[#allocation2 + $0x60] sm:$0xff]  ;;  %v53_v17 = vld [vmem:[#allocation2 + $0x68] sm:$0xff]  ;;  %v46_v18 = vld [vmem:[#allocation2 + $0x30] sm:$0xff]  ;;  %p424_p5 = por %p423_p4, %p422_p3 }
  0x2c   :  { %365 = vmatprep.subr.bf16.mxu1 %v360_v7  ;;  %v54_v19 = vld [vmem:[#allocation2 + $0x70] sm:$0xff]  ;;  %v47_v20 = vld [vmem:[#allocation2 + $0x38] sm:$0xff] }
  0x2d   :  { %v55_v21 = vld [vmem:[#allocation2 + $0x78] sm:$0xff]  ;;  %p425_p6 = pnand %p424_p5, %p418_p2 }
  0x2e   :  { %363 = vmatpush3.bf16.msra.mxu0 %v360_v7 }
  0x2f   :  { %367 = vmatpush3.bf16.msra.mxu1 %v360_v7 }
  0x31   :  { %333 = vmatmul.mubr.msk.f32.vlgmr.msra.gmra.mrb[0].mxu0 %vm60_vm0, %v41_v8 }
  0x32   :  { %345 = vmatmul.mubr.msk.f32.vlgmr.msra.gmra.mrb[0].mxu1 %vm60_vm0, %v49_v9  ;;  %335 = vmatprep.mubr.msk.f32.mxu0 %vm60_vm0, %v42_v10 }
  0x33   :  { %347 = vmatprep.mubr.msk.f32.mxu1 %vm60_vm0, %v50_v11 }
  0x35   :  { %336 = vmatmul.mubr.msk.f32.gmra.mrb[2].mxu0 %vm60_vm0, %v43_v12 }
  0x36   :  { %348 = vmatmul.mubr.msk.f32.gmra.mrb[2].mxu1 %vm60_vm0, %v51_v13  ;;  %338 = vmatprep.mubr.msk.f32.mxu0 %vm60_vm0, %v44_v14 }
  0x37   :  { %350 = vmatprep.mubr.msk.f32.mxu1 %vm60_vm0, %v52_v15 }
  0x39   :  { %339 = vmatmul.mubr.msk.f32.gmra.mrb[4].mxu0 %vm60_vm0, %v45_v16 }
  0x3a   :  { %351 = vmatmul.mubr.msk.f32.gmra.mrb[4].mxu1 %vm60_vm0, %v53_v17  ;;  %341 = vmatprep.mubr.msk.f32.mxu0 %vm60_vm0, %v46_v18 }
  0x3b   :  { %353 = vmatprep.mubr.msk.f32.mxu1 %vm60_vm0, %v54_v19 }
  0x3d   :  { %342 = vmatmul.mubr.msk.f32.gmra.mrb[6].mxu0 %vm60_vm0, %v47_v20 }
  0x3e   :  { %354 = vmatmul.mubr.msk.f32.gmra.mrb[6].mxu1 %vm60_vm0, %v55_v21 }
 0x104   :  { %v334_v22 = vpop.f32.mrb[0].mxu0 }
 0x105   :  { %v346_v23 = vpop.f32.mrb[0].mxu1  ;;  %255 = vst [vmem:[#allocation7 + $0x8] sm:$0xff] %v334_v22  ;;  %v175_v24 = vpop.f32.mrb[1].mxu0 }
 0x106   :  { %263 = vst [vmem:[#allocation7 + $0x48] sm:$0xff] %v346_v23  ;;  %v215_v25 = vpop.f32.mrb[1].mxu1  ;;  %254 = vst [vmem:[#allocation7] sm:$0xff] %v175_v24 }
 0x107   :  { %262 = vst [vmem:[#allocation7 + $0x40] sm:$0xff] %v215_v25 }
 0x108   :  { %v337_v26 = vpop.f32.mrb[2].mxu0 }
 0x109   :  { %v349_v27 = vpop.f32.mrb[2].mxu1  ;;  %257 = vst [vmem:[#allocation7 + $0x18] sm:$0xff] %v337_v26  ;;  %v185_v28 = vpop.f32.mrb[3].mxu0 }
 0x10a   :  { %265 = vst [vmem:[#allocation7 + $0x58] sm:$0xff] %v349_v27  ;;  %v225_v29 = vpop.f32.mrb[3].mxu1  ;;  %256 = vst [vmem:[#allocation7 + $0x10] sm:$0xff] %v185_v28 }
 0x10b   :  { %264 = vst [vmem:[#allocation7 + $0x50] sm:$0xff] %v225_v29 }
 0x10c   :  { %v340_v30 = vpop.f32.mrb[4].mxu0 }
 0x10d   :  { %v352_v31 = vpop.f32.mrb[4].mxu1  ;;  %259 = vst [vmem:[#allocation7 + $0x28] sm:$0xff] %v340_v30  ;;  %v195_v32 = vpop.f32.mrb[5].mxu0 }
 0x10e   :  { %267 = vst [vmem:[#allocation7 + $0x68] sm:$0xff] %v352_v31  ;;  %v235_v33 = vpop.f32.mrb[5].mxu1  ;;  %258 = vst [vmem:[#allocation7 + $0x20] sm:$0xff] %v195_v32 }
 0x10f   :  { %266 = vst [vmem:[#allocation7 + $0x60] sm:$0xff] %v235_v33 }
 0x110   :  { %v343_v34 = vpop.f32.mrb[6].mxu0 }
 0x111   :  { %v355_v35 = vpop.f32.mrb[6].mxu1  ;;  %261 = vst [vmem:[#allocation7 + $0x38] sm:$0xff] %v343_v34  ;;  %v205_v36 = vpop.f32.mrb[7].mxu0 }
 0x112   :  { %269 = vst [vmem:[#allocation7 + $0x78] sm:$0xff] %v355_v35  ;;  %v245_v37 = vpop.f32.mrb[7].mxu1  ;;  %260 = vst [vmem:[#allocation7 + $0x30] sm:$0xff] %v205_v36 }
 0x113   :  { %268 = vst [vmem:[#allocation7 + $0x70] sm:$0xff] %v245_v37 }
 0x114   :  { %428 = shalt.err (!%p425_p6)
}
 0x115   :  { %s429_s10 = scalar_lea.hbm %s528_s2, 2048 }
 0x116   :  { %p430_p7 = scmp.ne.s32.totalorder %s528_s2, %s429_s10  ;;  %p433_p8 = scmp.lt.u32.totalorder %s429_s10, %s528_s2 }
 0x118   :  { %p435_p9 = pnand %p433_p8, %p430_p7 }
 0x11a   :  { %438 = shalt.err (!%p435_p9)
}
 0x11b   :  { %281 = dma.vmem_to_hbm [thread:$0]  %s276_s6, 2048, %s528_s2, [#allocation4], %s446_s19, %s446_s19, %s447_s20  }
 0x11c   :  { %443 = dma.done.wait [#allocation4], 2048  }
 0x11d   :  { %444 = vsyncadd [#allocation4], 4294965248 }
 0x11e   :  { %285 = vsyncpa [#allocation3], 1 }
 0x11f   :  { %286 = vsyncpa [#allocation6], 1 }
 0x120   :  { %287 = vsyncpa [#allocation4], 1 }

</bundles_post_ra>
